<compile_context>
chip_gen: v7x
topology: tpu7x:2x2x1
jax: 0.10.0
libtpu: 0.0.40
codegen_flags: <defaults>
</compile_context>

<pallas_src>
import functools

import jax
import jax.numpy as jnp
from jax.experimental import pallas as pl
from jax.experimental.pallas import tpu as pltpu


def _noise_injector_kernel(fm_ref, res_ref, scl_ref, wc_ref, bc_ref, o_ref):
    # fm_ref : (1, n_hidden, hw_tile)  feature-map spatial tile (lane-dense)
    # res_ref: (1, n_hidden, 1)        precomputed Linear_r(z) for this batch
    # scl_ref: (1, n_hidden, 1)        precomputed Linear_s(z) + 1e-5
    # wc_ref : (n_out, n_hidden)       1x1-conv weight
    # bc_ref : (n_out, 1)              1x1-conv bias
    # o_ref  : (1, n_out, hw_tile)
    mod = (fm_ref[0] + res_ref[0]) * scl_ref[0]              # VPU, lane broadcast
    out = jnp.dot(wc_ref[...], mod,
                  preferred_element_type=jnp.float32) + bc_ref[...]
    o_ref[0] = out.astype(o_ref.dtype)


def _pick_hw_tile(hw, n_hidden, n_out, itemsize, budget_bytes=24 << 20):
    """Largest lane-dense (multiple of 128) spatial tile whose double-buffered
    input+output tiles fit the VMEM budget (budget sized for v7x's 64 MiB)."""
    if hw <= 128:
        return hw
    per_col = 2 * (n_hidden + n_out) * itemsize   # double-buffered in + out per column
    max_tile = max(128, ((budget_bytes // per_col) // 128) * 128)
    return int(min(max_tile, hw))


@functools.partial(jax.jit, static_argnames=("n_hidden", "z_dim", "n_out"))
def noise_injector_forward(feature_map, z, params, *, n_hidden, z_dim, n_out):
    """feature_map: (B, n_hidden, H, W) NCHW; z: (B, z_dim)."""
    B, C, H, W = feature_map.shape
    assert C == n_hidden and z.shape == (B, z_dim)
    HW = H * W
    dtype = feature_map.dtype
    itemsize = jnp.dtype(dtype).itemsize

    # ---- Hoisted z-linears: one fused batched GEMM in XLA ------------------
    wr = params["w_res"]                        # (n_hidden, z_dim)
    ws = params["w_scale"]                      # (n_hidden, z_dim)
    br = params["b_res"]                        # (n_hidden,)
    bs = params["b_scale"]                      # (n_hidden,)
    w_rs = jnp.concatenate([wr, ws], axis=0)    # (2*n_hidden, z_dim)
    b_rs = jnp.concatenate([br, bs], axis=0)    # (2*n_hidden,)
    rs = z @ w_rs.T + b_rs                      # (B, 2*n_hidden), f32 GEMM
    residual = rs[:, :n_hidden].astype(dtype).reshape(B, n_hidden, 1)
    scale = (rs[:, n_hidden:] + 1e-5).astype(dtype).reshape(B, n_hidden, 1)

    fm = feature_map.reshape(B, n_hidden, HW)
    wc = params["w_conv"].reshape(n_out, n_hidden).astype(dtype)   # 1x1 conv weight
    bc = params["b_conv"].reshape(n_out, 1).astype(jnp.float32)

    # ---- Spatial tiling + explicit VMEM budget ------------------------------
    hw_tile = _pick_hw_tile(HW, n_hidden, n_out, itemsize)
    n_spatial = pl.cdiv(HW, hw_tile)

    tile_vmem = 2 * (n_hidden + n_out) * hw_tile * itemsize      # double-buffered fm+out
    const_vmem = (4 * n_hidden + n_out * n_hidden + n_out) * 4   # res/scl/weights/bias
    vmem_limit = int(max(int((tile_vmem + const_vmem) * 1.5), 32 << 20))

    const_spec = lambda shape: pl.BlockSpec(shape, lambda b, s: (0, 0))

    out = pl.pallas_call(
        _noise_injector_kernel,
        out_shape=jax.ShapeDtypeStruct((B, n_out, HW), dtype),
        grid_spec=pltpu.PrefetchScalarGridSpec(
            num_scalar_prefetch=0,
            grid=(B, n_spatial),                                      # spatial innermost
            in_specs=[
                pl.BlockSpec((1, n_hidden, hw_tile), lambda b, s: (b, 0, s)),  # fm tile
                pl.BlockSpec((1, n_hidden, 1), lambda b, s: (b, 0, 0)),        # residual
                pl.BlockSpec((1, n_hidden, 1), lambda b, s: (b, 0, 0)),        # scale+eps
                const_spec((n_out, n_hidden)),                                 # w_conv
                const_spec((n_out, 1)),                                        # b_conv
            ],
            out_specs=pl.BlockSpec((1, n_out, hw_tile), lambda b, s: (b, 0, s)),
        ),
        compiler_params=pltpu.CompilerParams(
            dimension_semantics=("parallel", "parallel"),
            vmem_limit_bytes=vmem_limit),
    )(fm, residual, scale, wc, bc)

    return out.reshape(B, n_out, H, W)


def init_params(key, n_hidden, z_dim, n_out):
    """Deterministic parameter init mirroring the PyTorch __init__ recipe."""
    k1, k2, k3, k4 = jax.random.split(key, 4)

    # Linear layers: xavier_uniform weight, zero bias (weights_init).
    def xavier_uniform(k, fan_out, fan_in):
        bound = jnp.sqrt(6.0 / (fan_in + fan_out))
        return jax.random.uniform(k, (fan_out, fan_in), jnp.float32, -bound, bound)

    w_res = xavier_uniform(k1, n_hidden, z_dim)
    b_res = jnp.zeros((n_hidden,), jnp.float32)
    w_scale = xavier_uniform(k2, n_hidden, z_dim)
    b_scale = jnp.zeros((n_hidden,), jnp.float32)

    # Conv2d 1x1: orthogonal weight, truncated-normal bias (std=0.001).
    w_conv = jax.nn.initializers.orthogonal()(k3, (n_out, n_hidden), jnp.float32)
    w_conv = w_conv.reshape(n_out, n_hidden, 1, 1)
    b_conv = jax.random.truncated_normal(k4, -2.0, 2.0, (n_out,), jnp.float32) * 0.001

    return {"w_res": w_res, "b_res": b_res,
            "w_scale": w_scale, "b_scale": b_scale,
            "w_conv": w_conv, "b_conv": b_conv}


def reference_forward(feature_map, z, params, n_hidden, n_out):
    """Pure-JAX reference (for correctness check)."""
    B = z.shape[0]
    residual = (z @ params["w_res"].T + params["b_res"]).reshape(B, n_hidden, 1, 1)
    scale = (z @ params["w_scale"].T + params["b_scale"]).reshape(B, n_hidden, 1, 1)
    fm = (feature_map + residual) * (scale + 1e-5)
    wc = params["w_conv"].reshape(n_out, n_hidden)
    out = jnp.einsum("oc,bchw->bohw", wc, fm) + params["b_conv"].reshape(1, n_out, 1, 1)
    return out


if __name__ == "__main__":
    B, n_hidden, z_dim, n_out, H, W = 2, 32, 8, 4, 16, 16

    key = jax.random.PRNGKey(0)
    k_fm, k_z, k_p = jax.random.split(key, 3)

    feature_map = jax.random.normal(k_fm, (B, n_hidden, H, W), jnp.float32)
    z = jax.random.normal(k_z, (B, z_dim), jnp.float32)
    params = init_params(k_p, n_hidden, z_dim, n_out)

    out = noise_injector_forward(feature_map, z, params,
                                 n_hidden=n_hidden, z_dim=z_dim, n_out=n_out)
    out = jax.block_until_ready(out)

    ref = reference_forward(feature_map, z, params, n_hidden, n_out)
    assert out.shape == (B, n_out, H, W)
    assert jnp.allclose(out, ref, atol=1e-5, rtol=1e-5)

    print("KERNEL_OK")
</pallas_src>

<mosaic_0001>
module attributes {stable_mosaic.version = 11 : i64} {
  func.func @_noise_injector_kernel(%arg0: i32, %arg1: i32, %arg2: memref<1x32x256xf32, #tpu.memory_space<vmem>>, %arg3: memref<1x32x1xf32, #tpu.memory_space<vmem>>, %arg4: memref<1x32x1xf32, #tpu.memory_space<vmem>>, %arg5: memref<4x32xf32, #tpu.memory_space<vmem>>, %arg6: memref<4x1xf32, #tpu.memory_space<vmem>>, %arg7: memref<1x4x256xf32, #tpu.memory_space<vmem>>) attributes {dimension_semantics = [#tpu.dimension_semantics<parallel>, #tpu.dimension_semantics<parallel>], iteration_bounds = array<i64: 2, 1>, scalar_prefetch = 0 : i64, scratch_operands = 0 : i64, tpu.core_type = #tpu.core_type<tc>, window_params = [{transform_indices = @transform_0, window_bounds = array<i64: 1, 32, 256>}, {transform_indices = @transform_1, window_bounds = array<i64: 1, 32, 1>}, {transform_indices = @transform_2, window_bounds = array<i64: 1, 32, 1>}, {pipeline_mode = #tpu.pipeline_mode<synchronous>, transform_indices = @transform_3, window_bounds = array<i64: 4, 32>}, {pipeline_mode = #tpu.pipeline_mode<synchronous>, transform_indices = @transform_4, window_bounds = array<i64: 4, 1>}, {transform_indices = @transform_5, window_bounds = array<i64: 1, 4, 256>}]} {
    %c0 = arith.constant 0 : index
    %c0_0 = arith.constant 0 : index
    %c0_1 = arith.constant 0 : index
    %0 = vector.load %arg2[%c0, %c0_0, %c0_1] : memref<1x32x256xf32, #tpu.memory_space<vmem>>, vector<1x32x256xf32>
    %1 = vector.shape_cast %0 : vector<1x32x256xf32> to vector<32x256xf32>
    %c0_2 = arith.constant 0 : index
    %c0_3 = arith.constant 0 : index
    %c0_4 = arith.constant 0 : index
    %2 = vector.load %arg3[%c0_2, %c0_3, %c0_4] : memref<1x32x1xf32, #tpu.memory_space<vmem>>, vector<1x32x1xf32>
    %3 = vector.shape_cast %2 : vector<1x32x1xf32> to vector<32x1xf32>
    %4 = vector.broadcast %3 : vector<32x1xf32> to vector<32x256xf32>
    %5 = arith.addf %1, %4 : vector<32x256xf32>
    %c0_5 = arith.constant 0 : index
    %c0_6 = arith.constant 0 : index
    %c0_7 = arith.constant 0 : index
    %6 = vector.load %arg4[%c0_5, %c0_6, %c0_7] : memref<1x32x1xf32, #tpu.memory_space<vmem>>, vector<1x32x1xf32>
    %7 = vector.shape_cast %6 : vector<1x32x1xf32> to vector<32x1xf32>
    %8 = vector.broadcast %7 : vector<32x1xf32> to vector<32x256xf32>
    %9 = arith.mulf %5, %8 : vector<32x256xf32>
    %c0_8 = arith.constant 0 : index
    %c0_9 = arith.constant 0 : index
    %10 = vector.load %arg5[%c0_8, %c0_9] : memref<4x32xf32, #tpu.memory_space<vmem>>, vector<4x32xf32>
    %cst = arith.constant dense<0.000000e+00> : vector<4x256xf32>
    %11 = tpu.matmul %10, %9, %cst {dimension_numbers = #tpu.dot_dimension_numbers<[1], [0], [0], [1], [0, 0, 1, 1], [], []>} : vector<4x32xf32>, vector<32x256xf32>, vector<4x256xf32> -> vector<4x256xf32>
    %c0_10 = arith.constant 0 : index
    %c0_11 = arith.constant 0 : index
    %12 = vector.load %arg6[%c0_10, %c0_11] : memref<4x1xf32, #tpu.memory_space<vmem>>, vector<4x1xf32>
    %13 = vector.broadcast %12 : vector<4x1xf32> to vector<4x256xf32>
    %14 = arith.addf %11, %13 : vector<4x256xf32>
    %c0_12 = arith.constant 0 : index
    %c0_13 = arith.constant 0 : index
    %c0_14 = arith.constant 0 : index
    %15 = vector.load %arg7[%c0_12, %c0_13, %c0_14] : memref<1x4x256xf32, #tpu.memory_space<vmem>>, vector<1x4x256xf32>
    %16 = vector.shape_cast %15 : vector<1x4x256xf32> to vector<4x256xf32>
    %17 = vector.shape_cast %14 : vector<4x256xf32> to vector<1x4x256xf32>
    tpu.vector_store %arg7[%c0_12, %c0_13, %c0_14], %17 {strides = array<i32>} : memref<1x4x256xf32, #tpu.memory_space<vmem>>, vector<1x4x256xf32>,
    return
  }
  func.func @transform_0(%arg0: i32, %arg1: i32) -> (i32, i32, i32) {
    %c0_i32 = arith.constant 0 : i32
    %c0_i32_0 = arith.constant 0 : i32
    return %arg0, %c0_i32, %arg1 : i32, i32, i32
  }
  func.func @transform_1(%arg0: i32, %arg1: i32) -> (i32, i32, i32) {
    %c0_i32 = arith.constant 0 : i32
    %c0_i32_0 = arith.constant 0 : i32
    %c0_i32_1 = arith.constant 0 : i32
    return %arg0, %c0_i32, %c0_i32_0 : i32, i32, i32
  }
  func.func @transform_2(%arg0: i32, %arg1: i32) -> (i32, i32, i32) {
    %c0_i32 = arith.constant 0 : i32
    %c0_i32_0 = arith.constant 0 : i32
    %c0_i32_1 = arith.constant 0 : i32
    return %arg0, %c0_i32, %c0_i32_0 : i32, i32, i32
  }
  func.func @transform_3(%arg0: i32, %arg1: i32) -> (i32, i32) {
    %c0_i32 = arith.constant 0 : i32
    %c0_i32_0 = arith.constant 0 : i32
    %c0_i32_1 = arith.constant 0 : i32
    return %c0_i32, %c0_i32_0 : i32, i32
  }
  func.func @transform_4(%arg0: i32, %arg1: i32) -> (i32, i32) {
    %c0_i32 = arith.constant 0 : i32
    %c0_i32_0 = arith.constant 0 : i32
    %c0_i32_1 = arith.constant 0 : i32
    return %c0_i32, %c0_i32_0 : i32, i32
  }
  func.func @transform_5(%arg0: i32, %arg1: i32) -> (i32, i32, i32) {
    %c0_i32 = arith.constant 0 : i32
    %c0_i32_0 = arith.constant 0 : i32
    return %arg0, %c0_i32, %arg1 : i32, i32, i32
  }
}

</mosaic_0001>

<bundles_post_ra>
// kernel: noise_injector_forward.1
= control target key start
LH: loop header
LB: loop body
LE: loop exit
PB: predicated region body
PF: predicated region fallthrough
CT: control target
= control target key end

     0   :  { %s686_s18 = smov 0   ;;  %s688_s19 = smov 0   ;;  %s736_s0 = inlined_call_operand.vmem [shape: f32[2,32,256], index: 0, kind: input, shape index: {}]   ;;  %s737_s1 = inlined_call_operand.vmem [shape: f32[2,32,1], index: 1, kind: input, shape index: {}]   ;;  %s738_s2 = inlined_call_operand.vmem [shape: f32[2,32,1], index: 2, kind: input, shape index: {}]   ;;  %s739_s3 = inlined_call_operand.vmem [shape: f32[4,32], index: 3, kind: input, shape index: {}]   ;;  %s740_s4 = inlined_call_operand.vmem [shape: f32[4,1], index: 4, kind: input, shape index: {}]   ;;  %s741_s5 = inlined_call_operand.vmem [shape: f32[2,4,256], index: 5, kind: output, shape index: {}]  }
   0x1   :  { %s690_s20 = smov 0  }
   0x2 LB: > { %s27_s21 = sadd.s32 1, %s648_s19  ;;  %p578_p0 = scmp.ge.s32.totalorder %s652_s20, 1  ;;  %s652_s20 = sphi %s690_s20, %s15_s20   ;;  %s648_s19 = sphi %s688_s19, %s743_s19   ;;  %s644_s18 = sphi %s686_s18, %s742_s18  }
   0x3   : > { %p29_p1 = scmp.ge.s32.totalorder %s27_s21, 2  ;;  %p228_p2 = scmp.lt.s32.totalorder %s652_s20, 3 }
   0x5   : > { %s745_s21 = smov (%p29_p1, %s27_s21), 0  ;;  %p229_p3 = pnand %p578_p0, %p228_p2 }
   0x6   : > { %p275_p4 = scmp.lt.s32.totalorder (!%p229_p3), %s644_s18, 1  ;;  %v654_v0 = vmov (!%p229_p3), 0   ;;  %v377_v9 = vld [vmem:[%s740_s4] sm:$0xf] (!%p229_p3)  ;;  %v655_v10 = vmov (!%p229_p3), 0.0   ;;  %vm383_vm0 = vcmask (!%p229_p3), 261120  }
   0x7   : > { %232 = sbr.rel (%p229_p3) target bundleno = 385 (0x181), region = 40  ;;  %629 = vset.pattern.permute.xlu1 (!%p229_p3), %v654_v0  ;;  %628 = vset.pattern.permute.xlu0 (!%p229_p3), %v654_v0  ;;  %v376_v47 = vld [vmem:[%s739_s3] sm:$0xf] (!%p229_p3) }
   0x8   : > { %451 = vmatprep.mubr.f32.mxu0 (!%p229_p3), %v655_v10 }
   0xe   : > { %s747_s18 = smov (!%p275_p4, %s644_s18), 1 }
   0xf   : > { %s591_s22 = sshll.u32 %s747_s18, 5  ;;  %s590_s6 = sshll.u32 %s747_s18, 6 }
  0x10   : > { %s293_s25 = scalar_lea.vmem %s738_s2, %s591_s22  ;;  %s288_s28 = scalar_lea.vmem %s737_s1, %s591_s22 }
  0x11   : > { %v344_v1 = vld [vmem:[%s293_s25] sm:$0xff]  ;;  %v345_v3 = vld [vmem:[%s293_s25 + $0x8] sm:$0xff]  ;;  %v315_v5 = vld [vmem:[%s288_s28 + $0x18] sm:$0xff]  ;;  %s282_s9 = scalar_lea.vmem %s736_s0, %s590_s6  ;;  %s593_s12 = sshll.u32 %s747_s18, 3 }
  0x12   : > { %350 = vperm.xlu1 %629, %v344_v1   ;;  %v312_v2 = vld [vmem:[%s288_s28] sm:$0xff]  ;;  %v313_v4 = vld [vmem:[%s288_s28 + $0x8] sm:$0xff]  ;;  %v314_v6 = vld [vmem:[%s288_s28 + $0x10] sm:$0xff]  ;;  %s302_s15 = scalar_lea.vmem %s741_s5, %s593_s12 }
  0x13   : > { %318 = vperm.xlu0 %628, %v312_v2   ;;  %v347_v7 = vld [vmem:[%s293_s25 + $0x18] sm:$0xff]  ;;  %v346_v8 = vld [vmem:[%s293_s25 + $0x10] sm:$0xff]  ;;  %v304_v13 = vld [vmem:[%s282_s9] sm:$0xff] }
  0x14   : > { %v305_v14 = vld [vmem:[%s282_s9 + $0x8] sm:$0xff]  ;;  %v306_v15 = vld [vmem:[%s282_s9 + $0x10] sm:$0xff]  ;;  %v307_v16 = vld [vmem:[%s282_s9 + $0x18] sm:$0xff] }
  0x15   : > { %v310_v24 = vld [vmem:[%s282_s9 + $0x30] sm:$0xff]  ;;  %v311_v25 = vld [vmem:[%s282_s9 + $0x38] sm:$0xff]  ;;  %v308_v31 = vld [vmem:[%s282_s9 + $0x20] sm:$0xff] }
  0x16   : > { %355 = vperm.xlu1 %629, %v345_v3   ;;  %v309_v32 = vld [vmem:[%s282_s9 + $0x28] sm:$0xff] }
  0x17   : > { %323 = vperm.xlu0 %628, %v313_v4  }
  0x1a   : > { %333 = vperm.xlu1 %629, %v315_v5  }
  0x1b   : > { %328 = vperm.xlu0 %628, %v314_v6  }
  0x1e   : > { %365 = vperm.xlu1 %629, %v347_v7  }
  0x1f   : > { %360 = vperm.xlu0 %628, %v346_v8  }
  0x23   : > { %380 = vperm.xlu0 %628, %v377_v9  }
  0x91   : > { %v351_v11 = vpop.permute.xlu1 %350 }
  0x92   : > { %v319_v12 = vpop.permute.xlu0 %318 }
  0x93   : > { %v336_v17 = vadd.f32 %v319_v12, %v304_v13  ;;  %v337_v18 = vadd.f32 %v319_v12, %v305_v14 }
  0x95   : > { %v356_v19 = vpop.permute.xlu1 %355  ;;  %v369_v26 = vmul.f32 %v351_v11, %v337_v18  ;;  %v368_v28 = vmul.f32 %v351_v11, %v336_v17 }
  0x96   : > { %v324_v20 = vpop.permute.xlu0 %323 }
  0x97   : > { %v338_v21 = vadd.f32 %v324_v20, %v306_v15  ;;  %v339_v22 = vadd.f32 %v324_v20, %v307_v16 }
  0x99   : > { %v334_v23 = vpop.permute.xlu1 %333  ;;  %v371_v27 = vmul.f32 %v356_v19, %v339_v22  ;;  %v370_v29 = vmul.f32 %v356_v19, %v338_v21 }
  0x9a   : > { %v329_v30 = vpop.permute.xlu0 %328  ;;  %v342_v35 = vadd.f32 %v334_v23, %v310_v24  ;;  %v343_v36 = vadd.f32 %v334_v23, %v311_v25 }
  0x9b   : > { %v594_v33 = vpack.c.bf16 %v371_v27, %v369_v26  ;;  %v596_v34 = vpack.c.bf16 %v370_v29, %v368_v28  ;;  %v340_v37 = vadd.f32 %v329_v30, %v308_v31  ;;  %v341_v38 = vadd.f32 %v329_v30, %v309_v32 }
  0x9d   : > { %595 = vmatprep.subr.bf16.mxu0 %v594_v33  ;;  %v366_v39 = vpop.permute.xlu1 %365 }
  0x9e   : > { %v374_v40 = vmul.f32 %v366_v39, %v342_v35  ;;  %v375_v41 = vmul.f32 %v366_v39, %v343_v36  ;;  %v361_v42 = vpop.permute.xlu0 %360  ;;  %597 = vmatpush1.bf16.msra.mxu0 %v596_v34 }
  0x9f   : > { %v372_v43 = vmul.f32 %v361_v42, %v340_v37  ;;  %v373_v44 = vmul.f32 %v361_v42, %v341_v38 }
  0xa1   : > { %v598_v45 = vpack.c.bf16 %v375_v41, %v373_v44  ;;  %v600_v46 = vpack.c.bf16 %v374_v40, %v372_v43 }
  0xa2   : > { %v381_v48 = vpop.permute.xlu0 %380 }
  0xa3   : > { %599 = vmatprep.subr.bf16.mxu0 %v598_v45 }
  0xa4   : > { %601 = vmatpush1.bf16.msra.mxu0 %v600_v46 }
  0xa7   : > { %587 = vmatmul.mubr.msk.f32.vlgmr.msra.gmra.mrb[0].mxu0 %vm383_vm0, %v376_v47 }
 0x17a   : > { %v453_v49 = vpop.f32.mrb[0].mxu0 }
 0x17b   : > { %v454_v50 = vadd.f32 %v453_v49, %v381_v48  ;;  %v455_v51 = vpop.f32.mrb[1].mxu0 }
 0x17c   : > { %v456_v52 = vadd.f32 %v455_v51, %v381_v48 }
 0x17e   : > { %v460_v53 = vcombine.low %v454_v50, %v456_v52 }
 0x180   : > { %462 = vst [vmem:[%s302_s15] sm:$0xff] %v460_v53 }
 0x181 PF: > { %s15_s20 = sadd.s32 1, %s652_s20   ;;  %s742_s18 = smov %s648_s19 }
 0x182   : > { %p12_p5 = scmp.ge.s32.totalorder %s15_s20, 4   ;;  %s743_s19 = smov %s745_s21 }
 0x184   :  { %14 = sbr.rel (!%p12_p5) target bundleno = 2 (0x2), region = 76 }

</bundles_post_ra>
